<compile_context>
chip_gen: v7x
topology: tpu7x:2x2x1
jax: 0.10.0
libtpu: 0.0.40
codegen_flags: <defaults>
</compile_context>

<pallas_src>
import jax
import jax.numpy as jnp
from jax.experimental import pallas as pl
from jax.experimental.pallas import tpu as pltpu


def _residual_linear_kernel(x_lhs_ref, w_ref, b_ref, x_res_ref, o_ref, acc_ref):
    """One (TM, TN) output tile, accumulated over the K grid axis.

    o = x @ W + b + x   (bias + residual fused, added once at the last K step)
    """
    k = pl.program_id(2)

    @pl.when(k == 0)
    def _init():
        acc_ref[...] = jnp.zeros_like(acc_ref)

    # MXU matmul, f32 accumulation (valid for f32 or bf16 inputs).
    acc_ref[...] += jnp.dot(x_lhs_ref[...], w_ref[...],
                            preferred_element_type=jnp.float32)

    @pl.when(k == pl.num_programs(2) - 1)
    def _finalize():
        # Bias + residual in f32 (VALU slack under the MXU-bound loop), one
        # cast on the lane-dense store.  NOTE: residual is the (i, j) N-slice
        # of x (x_res_ref), NOT the (i, k) LHS tile.
        out = acc_ref[...] + b_ref[...] + x_res_ref[...]
        o_ref[...] = out.astype(o_ref.dtype)


def _pick_tile(extent, preferred, align):
    """Largest multiple of `align` dividing `extent`, capped at `preferred`.
    Falls back to the full extent (always a legal block dim) when `extent`
    is not `align`-aligned (e.g. dim=32 < 128 lanes)."""
    if extent % align != 0:
        return extent
    t = min(preferred, extent)
    t = max(t - t % align, align)
    while extent % t != 0:
        t -= align
    return t


def residual_linear(x, w, b, *, tm=None, tn=None, tk=None):
    """Residual(Linear): returns x @ w + b + x.

    x: (batch, seq, dim);  w: (dim, dim);  b: (dim,)
    """
    batch, seq, dim = x.shape
    m = batch * seq
    x2d = x.reshape(m, dim)
    b2d = b.reshape(1, dim)

    # MXU/lane-friendly tiles: sublane-aligned M tile, 128-aligned lane tiles.
    tm = tm or _pick_tile(m, 256, 8)
    tn = tn or _pick_tile(dim, 256, 128)
    tk = tk or _pick_tile(dim, 512, 128)
    grid = (m // tm, dim // tn, dim // tk)

    in_bytes = x.dtype.itemsize
    # Double-buffered inputs/outputs + f32 accumulator scratch, with headroom.
    need = 2 * (tm * tk + tk * tn + tn + tm * tn + tm * tn) * in_bytes + tm * tn * 4
    vmem_limit = int(min(max(4 * need, 16 << 20), 48 << 20))

    cost = pl.CostEstimate(
        flops=2 * m * dim * dim + 2 * m * dim,
        transcendentals=0,
        bytes_accessed=(2 * m * dim + dim * dim + dim) * in_bytes
        + m * dim * in_bytes,
    )

    out2d = pl.pallas_call(
        _residual_linear_kernel,
        out_shape=jax.ShapeDtypeStruct((m, dim), x.dtype),
        grid_spec=pltpu.PrefetchScalarGridSpec(
            num_scalar_prefetch=0,
            grid=grid,
            in_specs=[
                pl.BlockSpec((tm, tk), lambda i, j, k: (i, k)),  # x LHS panel
                pl.BlockSpec((tk, tn), lambda i, j, k: (k, j)),  # W panel
                pl.BlockSpec((1, tn), lambda i, j, k: (0, j)),   # bias slice
                pl.BlockSpec((tm, tn), lambda i, j, k: (i, j)),  # x residual slice
            ],
            out_specs=pl.BlockSpec((tm, tn), lambda i, j, k: (i, j)),
            scratch_shapes=[pltpu.VMEM((tm, tn), jnp.float32)],
        ),
        compiler_params=pltpu.CompilerParams(
            dimension_semantics=("parallel", "parallel", "arbitrary"),
            vmem_limit_bytes=vmem_limit,
        ),
        cost_estimate=cost,
    )(x2d, w, b2d, x2d)

    return out2d.reshape(batch, seq, dim)


if __name__ == "__main__":
    key = jax.random.PRNGKey(0)
    kx, kw, kb = jax.random.split(key, 3)

    # --- Small canonical shape for the Residual(Linear) module. ---
    batch, seq, dim = 2, 8, 32
    x = jax.random.normal(kx, (batch, seq, dim), dtype=jnp.float32)
    bound = 1.0 / (dim ** 0.5)
    w = jax.random.uniform(kw, (dim, dim), minval=-bound, maxval=bound,
                           dtype=jnp.float32)
    b = jax.random.uniform(kb, (dim,), minval=-bound, maxval=bound,
                           dtype=jnp.float32)

    out = residual_linear(x, w, b)
    jax.block_until_ready(out)
    ref = jnp.einsum("bsd,de->bse", x, w) + b + x
    assert jnp.allclose(out, ref, atol=1e-5, rtol=1e-5), "mismatch (small shape)"

    # --- Second check: exercises the tiled (M, N, K) grid and the fused
    # residual taken from the (i, j) N-slice.  Inputs are bf16-quantized then
    # kept as f32 so MXU input rounding is exact; only summation order differs
    # from the f32 reference.
    batch2, seq2, dim2 = 2, 64, 256
    k2x, k2w, k2b = jax.random.split(jax.random.PRNGKey(1), 3)
    x2 = jax.random.normal(k2x, (batch2, seq2, dim2), dtype=jnp.float32)
    bound2 = 1.0 / (dim2 ** 0.5)
    w2 = jax.random.uniform(k2w, (dim2, dim2), minval=-bound2, maxval=bound2,
                            dtype=jnp.float32)
    b2 = jax.random.uniform(k2b, (dim2,), minval=-bound2, maxval=bound2,
                            dtype=jnp.float32)
    x2 = x2.astype(jnp.bfloat16).astype(jnp.float32)
    w2 = w2.astype(jnp.bfloat16).astype(jnp.float32)
    b2 = b2.astype(jnp.bfloat16).astype(jnp.float32)

    out2 = residual_linear(x2, w2, b2, tm=64, tn=128, tk=128)  # grid = (2, 2, 2)
    jax.block_until_ready(out2)
    ref2 = jnp.einsum("bsd,de->bse", x2, w2,
                      precision=jax.lax.Precision.HIGHEST) + b2 + x2
    assert jnp.allclose(out2, ref2, atol=1e-3, rtol=1e-3), "mismatch (tiled shape)"

    print("KERNEL_OK")
</pallas_src>

<mosaic_0001>
module attributes {stable_mosaic.version = 11 : i64} {
  func.func @_residual_linear_kernel(%arg0: i32, %arg1: i32, %arg2: i32, %arg3: memref<16x32xf32, #tpu.memory_space<vmem>>, %arg4: memref<32x32xf32, #tpu.memory_space<vmem>>, %arg5: memref<1x32xf32, #tpu.memory_space<vmem>>, %arg6: memref<16x32xf32, #tpu.memory_space<vmem>>, %arg7: memref<16x32xf32, #tpu.memory_space<vmem>>, %arg8: memref<16x32xf32, #tpu.memory_space<vmem>>) attributes {dimension_semantics = [#tpu.dimension_semantics<parallel>, #tpu.dimension_semantics<parallel>, #tpu.dimension_semantics<arbitrary>], iteration_bounds = array<i64: 1, 1, 1>, scalar_prefetch = 0 : i64, scratch_operands = 1 : i64, tpu.core_type = #tpu.core_type<tc>, window_params = [{transform_indices = @transform_0, window_bounds = array<i64: 16, 32>}, {transform_indices = @transform_1, window_bounds = array<i64: 32, 32>}, {transform_indices = @transform_2, window_bounds = array<i64: 1, 32>}, {transform_indices = @transform_3, window_bounds = array<i64: 16, 32>}, {transform_indices = @transform_4, window_bounds = array<i64: 16, 32>}]} {
    %c0_i32 = arith.constant 0 : i32
    %0 = arith.cmpi eq, %arg2, %c0_i32 : i32
    %1 = arith.extui %0 : i1 to i32
    %c0_i32_0 = arith.constant 0 : i32
    %2 = arith.cmpi ne, %1, %c0_i32_0 : i32
    scf.if %2 {
      %cst_10 = arith.constant 0.000000e+00 : f32
      %12 = vector.broadcast %cst_10 : f32 to vector<16x32xf32>
      %c0_11 = arith.constant 0 : index
      %c0_12 = arith.constant 0 : index
      %13 = vector.load %arg8[%c0_11, %c0_12] : memref<16x32xf32, #tpu.memory_space<vmem>>, vector<16x32xf32>
      tpu.vector_store %arg8[%c0_11, %c0_12], %12 {strides = array<i32>} : memref<16x32xf32, #tpu.memory_space<vmem>>, vector<16x32xf32>,
    } else {
    }
    %c0 = arith.constant 0 : index
    %c0_1 = arith.constant 0 : index
    %3 = vector.load %arg8[%c0, %c0_1] : memref<16x32xf32, #tpu.memory_space<vmem>>, vector<16x32xf32>
    %c0_2 = arith.constant 0 : index
    %c0_3 = arith.constant 0 : index
    %4 = vector.load %arg3[%c0_2, %c0_3] : memref<16x32xf32, #tpu.memory_space<vmem>>, vector<16x32xf32>
    %c0_4 = arith.constant 0 : index
    %c0_5 = arith.constant 0 : index
    %5 = vector.load %arg4[%c0_4, %c0_5] : memref<32x32xf32, #tpu.memory_space<vmem>>, vector<32x32xf32>
    %cst = arith.constant dense<0.000000e+00> : vector<16x32xf32>
    %6 = tpu.matmul %4, %5, %cst {dimension_numbers = #tpu.dot_dimension_numbers<[1], [0], [0], [1], [0, 0, 1, 1], [], []>} : vector<16x32xf32>, vector<32x32xf32>, vector<16x32xf32> -> vector<16x32xf32>
    %7 = arith.addf %3, %6 : vector<16x32xf32>
    %c0_6 = arith.constant 0 : index
    %c0_7 = arith.constant 0 : index
    %8 = vector.load %arg8[%c0_6, %c0_7] : memref<16x32xf32, #tpu.memory_space<vmem>>, vector<16x32xf32>
    tpu.vector_store %arg8[%c0_6, %c0_7], %7 {strides = array<i32>} : memref<16x32xf32, #tpu.memory_space<vmem>>, vector<16x32xf32>,
    %c0_i32_8 = arith.constant 0 : i32
    %9 = arith.cmpi eq, %arg2, %c0_i32_8 : i32
    %10 = arith.extui %9 : i1 to i32
    %c0_i32_9 = arith.constant 0 : i32
    %11 = arith.cmpi ne, %10, %c0_i32_9 : i32
    scf.if %11 {
      %c0_10 = arith.constant 0 : index
      %c0_11 = arith.constant 0 : index
      %12 = vector.load %arg8[%c0_10, %c0_11] : memref<16x32xf32, #tpu.memory_space<vmem>>, vector<16x32xf32>
      %c0_12 = arith.constant 0 : index
      %c0_13 = arith.constant 0 : index
      %13 = vector.load %arg5[%c0_12, %c0_13] : memref<1x32xf32, #tpu.memory_space<vmem>>, vector<1x32xf32>
      %14 = vector.broadcast %13 : vector<1x32xf32> to vector<16x32xf32>
      %15 = arith.addf %12, %14 : vector<16x32xf32>
      %c0_14 = arith.constant 0 : index
      %c0_15 = arith.constant 0 : index
      %16 = vector.load %arg6[%c0_14, %c0_15] : memref<16x32xf32, #tpu.memory_space<vmem>>, vector<16x32xf32>
      %17 = arith.addf %15, %16 : vector<16x32xf32>
      %c0_16 = arith.constant 0 : index
      %c0_17 = arith.constant 0 : index
      %18 = vector.load %arg7[%c0_16, %c0_17] : memref<16x32xf32, #tpu.memory_space<vmem>>, vector<16x32xf32>
      tpu.vector_store %arg7[%c0_16, %c0_17], %17 {strides = array<i32>} : memref<16x32xf32, #tpu.memory_space<vmem>>, vector<16x32xf32>,
    } else {
    }
    return
  }
  func.func @transform_0(%arg0: i32, %arg1: i32, %arg2: i32) -> (i32, i32) {
    %c0_i32 = arith.constant 0 : i32
    return %arg0, %arg2 : i32, i32
  }
  func.func @transform_1(%arg0: i32, %arg1: i32, %arg2: i32) -> (i32, i32) {
    %c0_i32 = arith.constant 0 : i32
    return %arg2, %arg1 : i32, i32
  }
  func.func @transform_2(%arg0: i32, %arg1: i32, %arg2: i32) -> (i32, i32) {
    %c0_i32 = arith.constant 0 : i32
    %c0_i32_0 = arith.constant 0 : i32
    return %c0_i32, %arg1 : i32, i32
  }
  func.func @transform_3(%arg0: i32, %arg1: i32, %arg2: i32) -> (i32, i32) {
    %c0_i32 = arith.constant 0 : i32
    return %arg0, %arg1 : i32, i32
  }
  func.func @transform_4(%arg0: i32, %arg1: i32, %arg2: i32) -> (i32, i32) {
    %c0_i32 = arith.constant 0 : i32
    return %arg0, %arg1 : i32, i32
  }
}

</mosaic_0001>

<bundles_post_ra>
// kernel: tpu_custom_call.1
= control target key start
LH: loop header
LB: loop body
LE: loop exit
PB: predicated region body
PF: predicated region fallthrough
CT: control target
= control target key end

     0   :  { %9 = vsyncpa [#allocation4], 0  ;;  %s437_s0 = inlined_call_operand.hbm [shape: f32[16,32], index: 0, kind: input, shape index: {}]   ;;  %s438_s1 = inlined_call_operand.hbm [shape: f32[32,32], index: 1, kind: input, shape index: {}]   ;;  %s439_s2 = inlined_call_operand.vmem [shape: f32[1,32], index: 2, kind: input, shape index: {}]   ;;  %s440_s3 = inlined_call_operand.hbm [shape: f32[16,32], index: 3, kind: input, shape index: {}]   ;;  %s441_s4 = inlined_call_operand.hbm [shape: f32[16,32], index: 4, kind: output, shape index: {}]  }
   0x1   :  { %10 = vsyncpa [#allocation7], 0 }
   0x2   :  { %11 = vsyncpa [#allocation5], 0  ;;  %s327_s15 = smov [#allocation6]   ;;  %s328_s17 = smov [#allocation3]  }
   0x3   :  { %s29_s16 = sshll.u32 %s327_s15, 4  ;;  %s17_s18 = sshll.u32 %s328_s17, 4  ;;  %s30_s16 = int_to_ptr.vmem [resolvable:$true] %s29_s16  ;;  %s359_s18 = int_to_ptr.vmem [resolvable:$true] %s17_s18 }
   0x4   :  { %s233_s21 = scalar_lea.hbm %s438_s1, 512 }
   0x5   :  { %p234_p0 = scmp.ne.s32.totalorder %s438_s1, %s233_s21  ;;  %p237_p1 = scmp.lt.u32.totalorder %s233_s21, %s438_s1 }
   0x7   :  { %p239_p2 = pnand %p237_p1, %p234_p0 }
   0x9   :  { %242 = shalt.err (!%p239_p2)
}
   0xa   :  { %s243_s26 = scalar_lea.vmem %s30_s16, 512  ;;  %p248_p4 = scmp.lt.s32.totalorder %s30_s16, %s30_s16 }
   0xb   :  { %p244_p3 = scmp.ne.s32.totalorder %s30_s16, %s243_s26  ;;  %p249_p5 = scmp.lt.s32.totalorder %s243_s26, %s243_s26 }
   0xd   :  { %p250_p6 = por %p249_p5, %p248_p4 }
   0xf   :  { %p251_p7 = pnand %p250_p6, %p244_p3 }
  0x11   :  { %254 = shalt.err (!%p251_p7)
}
  0x12   :  { %s329_s27 = smov 128   ;;  %s330_s28 = smov 8  }
  0x13   :  { %35 = dma.hbm_to_vmem [thread:$0]  %s438_s1, 512, %s30_s16, [#allocation7], %s329_s27, %s329_s27, %s330_s28  }
  0x14   :  { %s255_s7 = scalar_lea.hbm %s437_s0, 256 }
  0x15   :  { %p256_p8 = scmp.ne.s32.totalorder %s437_s0, %s255_s7  ;;  %p259_p9 = scmp.lt.u32.totalorder %s255_s7, %s437_s0 }
  0x17   :  { %p261_p10 = pnand %p259_p9, %p256_p8 }
  0x19   :  { %264 = shalt.err (!%p261_p10)
}
  0x1a   :  { %s265_s12 = scalar_lea.vmem %s359_s18, 256  ;;  %p270_p12 = scmp.lt.s32.totalorder %s359_s18, %s359_s18 }
  0x1b   :  { %p266_p11 = scmp.ne.s32.totalorder %s359_s18, %s265_s12  ;;  %p271_p13 = scmp.lt.s32.totalorder %s265_s12, %s265_s12 }
  0x1d   :  { %p272_p0 = por %p271_p13, %p270_p12 }
  0x1f   :  { %p273_p1 = pnand %p272_p0, %p266_p11 }
  0x21   :  { %276 = shalt.err (!%p273_p1)
}
  0x22   :  { %23 = dma.hbm_to_vmem [thread:$0]  %s437_s0, 256, %s359_s18, [#allocation4], %s329_s27, %s329_s27, %s330_s28  }
  0x23   :  { %s331_s14 = smov [#allocation8]   ;;  %s277_s19 = scalar_lea.hbm %s440_s3, 256 }
  0x24   :  { %s43_s15 = sshll.u32 %s331_s14, 4  ;;  %p278_p2 = scmp.ne.s32.totalorder %s440_s3, %s277_s19  ;;  %s44_s15 = int_to_ptr.vmem [resolvable:$true] %s43_s15 }
  0x25   :  { %p281_p3 = scmp.lt.u32.totalorder %s277_s19, %s440_s3 }
  0x27   :  { %p283_p4 = pnand %p281_p3, %p278_p2 }
  0x29   :  { %286 = shalt.err (!%p283_p4)
}
  0x2a   :  { %s287_s24 = scalar_lea.vmem %s44_s15, 256  ;;  %p292_p6 = scmp.lt.s32.totalorder %s44_s15, %s44_s15 }
  0x2b   :  { %p288_p5 = scmp.ne.s32.totalorder %s44_s15, %s287_s24  ;;  %p293_p7 = scmp.lt.s32.totalorder %s287_s24, %s287_s24 }
  0x2d   :  { %p294_p8 = por %p293_p7, %p292_p6 }
  0x2f   :  { %p295_p9 = pnand %p294_p8, %p288_p5 }
  0x31   :  { %298 = shalt.err (!%p295_p9)
}
  0x32   :  { %49 = dma.hbm_to_vmem [thread:$0]  %s440_s3, 256, %s44_s15, [#allocation7], %s329_s27, %s329_s27, %s330_s28  }
  0x33   :  { %321 = dma.done.wait [#allocation4], 256  }
  0x34   :  { %322 = vsyncadd [#allocation4], 4294967040 }
  0x35   :  { %323 = dma.done.wait [#allocation7], 768  }
  0x36   :  { %324 = vsyncadd [#allocation7], 4294966528  ;;  %vm63_vm0 = vcmask 261120   ;;  %v332_v0 = vmov 0.0   ;;  %v70_v1 = vld [vmem:[#allocation6] sm:$0xff]  ;;  %v71_v2 = vld [vmem:[#allocation6 + $0x8] sm:$0xff] }
  0x37   :  { %65 = vst.msk [vmem:[#allocation2 + $0x8] sm:$0xff] %vm63_vm0, %v332_v0  ;;  %64 = vst.msk [vmem:[#allocation2] sm:$0xff] %vm63_vm0, %v332_v0  ;;  %v72_v3 = vld [vmem:[#allocation6 + $0x10] sm:$0xff]  ;;  %v218_v4 = vpack.c.bf16 %v71_v2, %v70_v1  ;;  %v73_v5 = vld [vmem:[#allocation6 + $0x18] sm:$0xff]  ;;  %s333_s26 = smov [#allocation9]  }
  0x38   :  { %v68_v6 = vld [vmem:[#allocation3] sm:$0xff]  ;;  %v222_v7 = vpack.c.bf16 %v73_v5, %v72_v3  ;;  %v69_v8 = vld [vmem:[#allocation3 + $0x8] sm:$0xff]  ;;  %v200_v15 = vld [vmem:[%s439_s2] ss:$0 sm:$0xff]  ;;  %s185_s29 = sshll.u32 %s333_s26, 4  ;;  %s186_s29 = int_to_ptr.vmem [resolvable:$true] %s185_s29 }
  0x39   :  { %215 = vmatprep.mubr.msk.f32.mxu0 %vm63_vm0, %v68_v6  ;;  %219 = vmatprep.subr.bf16.mxu0 %v218_v4  ;;  %v175_v17 = vld [vmem:[#allocation8 + $0x8] sm:$0xff]  ;;  %v174_v20 = vld [vmem:[#allocation8] sm:$0xff]  ;;  %s299_s30 = scalar_lea.vmem %s186_s29, 256  ;;  %p304_p11 = scmp.lt.s32.totalorder %s186_s29, %s186_s29 }
  0x3a   :  { %221 = vmatpush3.bf16.msra.mxu0 %v218_v4  ;;  %p300_p10 = scmp.ne.s32.totalorder %s186_s29, %s299_s30  ;;  %p305_p12 = scmp.lt.s32.totalorder %s299_s30, %s299_s30 }
  0x3b   :  { %223 = vmatprep.subr.bf16.mxu0 %v222_v7 }
  0x3c   :  { %p306_p13 = por %p305_p12, %p304_p11 }
  0x3e   :  { %225 = vmatpush3.bf16.msra.mxu0 %v222_v7  ;;  %v67_v9 = vld [vmem:[#allocation2 + $0x8] sm:$0xff]  ;;  %v66_v10 = vld [vmem:[#allocation2] sm:$0xff]  ;;  %p307_p0 = pnand %p306_p13, %p300_p10 }
  0x41   :  { %216 = vmatmul.mubr.msk.f32.vlgmr.msra.gmra.mrb[0].mxu0 %vm63_vm0, %v69_v8 }
 0x114   :  { %v217_v11 = vpop.f32.mrb[0].mxu0 }
 0x115   :  { %v157_v12 = vadd.f32 %v217_v11, %v67_v9  ;;  %v147_v13 = vpop.f32.mrb[1].mxu0 }
 0x116   :  { %v156_v14 = vadd.f32 %v147_v13, %v66_v10 }
 0x117   :  { %159 = vst.msk [vmem:[#allocation2 + $0x8] sm:$0xff] %vm63_vm0, %v157_v12 }
 0x118   :  { %158 = vst.msk [vmem:[#allocation2] sm:$0xff] %vm63_vm0, %v156_v14 }
 0x11e   :  { %v164_v16 = vld [vmem:[#allocation2 + $0x8] sm:$0xff] }
 0x11f   :  { %v163_v18 = vld [vmem:[#allocation2] sm:$0xff]  ;;  %v173_v19 = vadd.f32 %v200_v15, %v164_v16 }
 0x120   :  { %v172_v21 = vadd.f32 %v200_v15, %v163_v18 }
 0x121   :  { %v177_v22 = vadd.f32 %v175_v17, %v173_v19 }
 0x122   :  { %v176_v23 = vadd.f32 %v174_v20, %v172_v21 }
 0x123   :  { %179 = vst.msk [vmem:[#allocation9 + $0x8] sm:$0xff] %vm63_vm0, %v177_v22 }
 0x124   :  { %178 = vst.msk [vmem:[#allocation9] sm:$0xff] %vm63_vm0, %v176_v23 }
 0x125   :  { %310 = shalt.err (!%p307_p0)
}
 0x126   :  { %s311_s6 = scalar_lea.hbm %s441_s4, 256 }
 0x127   :  { %p312_p1 = scmp.ne.s32.totalorder %s441_s4, %s311_s6  ;;  %p315_p2 = scmp.lt.u32.totalorder %s311_s6, %s441_s4 }
 0x129   :  { %p317_p3 = pnand %p315_p2, %p312_p1 }
 0x12b   :  { %320 = shalt.err (!%p317_p3)
}
 0x12c   :  { %191 = dma.vmem_to_hbm [thread:$0]  %s186_s29, 256, %s441_s4, [#allocation5], %s329_s27, %s329_s27, %s330_s28  }
 0x12d   :  { %325 = dma.done.wait [#allocation5], 256  }
 0x12e   :  { %326 = vsyncadd [#allocation5], 4294967040 }
 0x12f   :  { %195 = vsyncpa [#allocation4], 1 }
 0x130   :  { %196 = vsyncpa [#allocation7], 1 }
 0x131   :  { %197 = vsyncpa [#allocation5], 1 }

</bundles_post_ra>
